<compile_context>
chip_gen: v6e
topology: v6e:2x2x1
jax: 0.10.0
libtpu: 0.0.40
codegen_flags: <defaults>
</compile_context>

<pallas_src>
import functools

import jax
import jax.numpy as jnp
from jax.experimental import pallas as pl
from jax.experimental.pallas import tpu as pltpu

HID = 64        # hidden width of m_1 / m_2
OUT_SUB = 8     # head rows padded to one sublane group (true head width is 2)


def _round_up(n, m):
    return ((n + m - 1) // m) * m


def _choose_tm(total_rows, max_tm=4096):
    """Static (Python-int) tile choice: big tiles for big N, >=2 balanced grid
    steps when it is cheap to do so (v7x megacore), tiny cost model for the
    padding-vs-step-overhead trade-off."""
    rows = max(int(total_rows), 1)
    best_tm, best_cost = 128, None
    tm = 128
    while tm <= max_tm:
        steps = -(-rows // tm)
        # cost ~ rows actually streamed (incl. padding) + ~256-row-equivalent
        # fixed overhead per grid step; mild penalty for 1-step grids (v7x).
        cost = steps * tm + 256 * steps
        if steps == 1 and rows > 128:
            cost += tm
        if best_cost is None or cost < best_cost:
            best_tm, best_cost = tm, cost
        tm *= 2
    return best_tm


def _mlp_kernel(x_ref, w1_ref, b1_ref, w2_ref, b2_ref, w3_ref, b3_ref, o_ref):
    # Layer 1: bf16 [HID, d] @ bf16 [d, tm] -> f32 [HID, tm] on the MXU.
    h = jnp.dot(w1_ref[...], x_ref[...], preferred_element_type=jnp.float32)
    h = jnp.maximum(h + b1_ref[...], 0.0).astype(jnp.bfloat16)   # bias+ReLU f32
    # Layer 2: bf16 [HID, HID] @ bf16 [HID, tm] -> f32.
    h = jnp.dot(w2_ref[...], h, preferred_element_type=jnp.float32)
    h = jnp.maximum(h + b2_ref[...], 0.0).astype(jnp.bfloat16)
    # Layer 3: head padded to 8 sublanes -> full unmasked (8, tm) f32 store.
    o = jnp.dot(w3_ref[...], h, preferred_element_type=jnp.float32)
    o_ref[...] = jnp.maximum(o + b3_ref[...], 0.0)


@functools.partial(jax.jit, static_argnames=("tm",))
def _region_mask_mlp(xt, w1t, b1t, w2t, b2t, w3t, b3t, *, tm):
    """xt: [d_model, rows] bf16 (rows % tm == 0) -> [OUT_SUB, rows] f32."""
    d_model, rows = xt.shape
    assert rows % tm == 0
    grid = (rows // tm,)

    flops = 2 * rows * (d_model * HID + HID * HID + HID * OUT_SUB)
    bytes_accessed = (
        rows * d_model * 2                                   # x stream (bf16)
        + rows * OUT_SUB * 4                                 # output stream
        + (w1t.size + w2t.size + w3t.size) * 2               # bf16 weights
        + (b1t.size + b2t.size + b3t.size) * 4)              # f32 biases

    full = lambda i: (0, 0)  # weights/biases: same (only) block every step
    return pl.pallas_call(
        _mlp_kernel,
        out_shape=jax.ShapeDtypeStruct((OUT_SUB, rows), jnp.float32),
        grid_spec=pltpu.PrefetchScalarGridSpec(
            num_scalar_prefetch=0,
            grid=grid,
            in_specs=[
                pl.BlockSpec((d_model, tm), lambda i: (0, i)),  # x^T tile (bf16)
                pl.BlockSpec((HID, d_model), full),             # w1^T (bf16)
                pl.BlockSpec((HID, 1), full),                   # b1 (f32 column)
                pl.BlockSpec((HID, HID), full),                 # w2^T (bf16)
                pl.BlockSpec((HID, 1), full),                   # b2 (f32 column)
                pl.BlockSpec((OUT_SUB, HID), full),             # w3^T padded (bf16)
                pl.BlockSpec((OUT_SUB, 1), full),               # b3 padded (f32)
            ],
            out_specs=pl.BlockSpec((OUT_SUB, tm), lambda i: (0, i)),
        ),
        compiler_params=pltpu.CompilerParams(
            dimension_semantics=("parallel",)),
        cost_estimate=pl.CostEstimate(
            flops=flops, transcendentals=0, bytes_accessed=bytes_accessed),
    )(xt, w1t, b1t, w2t, b2t, w3t, b3t)


def region_mask_forward(src_feat, tgt_feat, params, *, max_tm=4096):
    """Mirrors RegionMask.forward.

    src_feat, tgt_feat: [1, N, d_model] (leading batch of 1, as implied by the
    .squeeze(0) in the PyTorch module). Returns (src_mask, tgt_mask): [N, 2].
    """
    w1, b1, w2, b2, w3, b3 = params
    d_model = w1.shape[0]
    n_out = w3.shape[1]

    # Transposed (points-on-lanes) weights; head padded to OUT_SUB sublanes.
    # Padded rows are zero through bias+ReLU so the [:n_out] slice is exact.
    w1t = w1.T.astype(jnp.bfloat16)
    w2t = w2.T.astype(jnp.bfloat16)
    w3t = jnp.pad(w3.T, ((0, OUT_SUB - n_out), (0, 0))).astype(jnp.bfloat16)
    b1t = b1.reshape(HID, 1).astype(jnp.float32)
    b2t = b2.reshape(HID, 1).astype(jnp.float32)
    b3t = jnp.pad(b3.reshape(n_out, 1), ((0, OUT_SUB - n_out), (0, 0)))
    b3t = b3t.astype(jnp.float32)

    src2d = src_feat.reshape(-1, d_model)
    tgt2d = tgt_feat.reshape(-1, d_model)
    ns, nt = src2d.shape[0], tgt2d.shape[0]
    total = ns + nt

    tm = _choose_tm(total, max_tm)
    rows_pad = _round_up(total, tm)

    # Fuse src + tgt into one launch; pad ONCE (the MLP is purely row-wise so
    # the halves need not be tile-aligned).  One transpose+pad+cast pass.
    xt = jnp.concatenate([src2d.T, tgt2d.T], axis=1)                 # [d, total]
    xt = jnp.pad(xt, ((0, 0), (0, rows_pad - total))).astype(jnp.bfloat16)

    out = _region_mask_mlp(xt, w1t, b1t, w2t, b2t, w3t, b3t, tm=tm)
    src_mask = out[:n_out, :ns].T
    tgt_mask = out[:n_out, ns:ns + nt].T
    return src_mask, tgt_mask  # already 2-D, i.e. squeezed


def init_params(key, d_model):
    """Deterministic synthetic init (shapes match the nn.Linear layers)."""
    k1, k2, k3, k4, k5, k6 = jax.random.split(key, 6)
    s1 = 1.0 / jnp.sqrt(d_model)
    s2 = 1.0 / jnp.sqrt(64.0)
    w1 = jax.random.uniform(k1, (d_model, HID), jnp.float32, -s1, s1)
    b1 = jax.random.uniform(k2, (1, HID), jnp.float32, -s1, s1)
    w2 = jax.random.uniform(k3, (HID, HID), jnp.float32, -s2, s2)
    b2 = jax.random.uniform(k4, (1, HID), jnp.float32, -s2, s2)
    w3 = jax.random.uniform(k5, (HID, 2), jnp.float32, -s2, s2)
    b3 = jax.random.uniform(k6, (1, 2), jnp.float32, -s2, s2)
    return (w1, b1, w2, b2, w3, b3)


if __name__ == "__main__":
    d_model = 32          # config['feature_dim']
    N = 200               # number of points (deliberately NOT a tile multiple)

    key = jax.random.PRNGKey(0)
    kp, ks, kt = jax.random.split(key, 3)
    params = init_params(kp, d_model)
    src_feat = jax.random.normal(ks, (1, N, d_model), jnp.float32)
    tgt_feat = jax.random.normal(kt, (1, N, d_model), jnp.float32)

    src_mask, tgt_mask = region_mask_forward(src_feat, tgt_feat, params)
    jax.block_until_ready((src_mask, tgt_mask))

    # Reference in plain JAX that mirrors the kernel's numerics exactly:
    # bf16 operands into every matmul, f32 accumulation / bias / ReLU.
    def ref_mlp(x, p):
        w1, b1, w2, b2, w3, b3 = p
        def lin(h, w, b):
            y = jnp.dot(h.astype(jnp.bfloat16), w.astype(jnp.bfloat16),
                        preferred_element_type=jnp.float32)
            return jnp.maximum(y + b, 0.0)
        h = lin(x, w1, b1)
        h = lin(h, w2, b2)
        return lin(h, w3, b3)

    ref_src = ref_mlp(src_feat[0], params)
    ref_tgt = ref_mlp(tgt_feat[0], params)
    assert src_mask.shape == (N, 2) and tgt_mask.shape == (N, 2)
    assert jnp.allclose(src_mask, ref_src, atol=2e-3, rtol=2e-3)
    assert jnp.allclose(tgt_mask, ref_tgt, atol=2e-3, rtol=2e-3)

    print("KERNEL_OK")
</pallas_src>

<mosaic_0001>
module attributes {stable_mosaic.version = 11 : i64} {
  func.func @_mlp_kernel(%arg0: i32, %arg1: memref<32x256xbf16, #tpu.memory_space<vmem>>, %arg2: memref<64x32xbf16, #tpu.memory_space<vmem>>, %arg3: memref<64x1xf32, #tpu.memory_space<vmem>>, %arg4: memref<64x64xbf16, #tpu.memory_space<vmem>>, %arg5: memref<64x1xf32, #tpu.memory_space<vmem>>, %arg6: memref<8x64xbf16, #tpu.memory_space<vmem>>, %arg7: memref<8x1xf32, #tpu.memory_space<vmem>>, %arg8: memref<8x256xf32, #tpu.memory_space<vmem>>) attributes {dimension_semantics = [#tpu.dimension_semantics<parallel>], iteration_bounds = array<i64: 2>, scalar_prefetch = 0 : i64, scratch_operands = 0 : i64, tpu.core_type = #tpu.core_type<tc>, window_params = [{transform_indices = @transform_0, window_bounds = array<i64: 32, 256>}, {pipeline_mode = #tpu.pipeline_mode<synchronous>, transform_indices = @transform_1, window_bounds = array<i64: 64, 32>}, {pipeline_mode = #tpu.pipeline_mode<synchronous>, transform_indices = @transform_2, window_bounds = array<i64: 64, 1>}, {pipeline_mode = #tpu.pipeline_mode<synchronous>, transform_indices = @transform_3, window_bounds = array<i64: 64, 64>}, {pipeline_mode = #tpu.pipeline_mode<synchronous>, transform_indices = @transform_4, window_bounds = array<i64: 64, 1>}, {pipeline_mode = #tpu.pipeline_mode<synchronous>, transform_indices = @transform_5, window_bounds = array<i64: 8, 64>}, {pipeline_mode = #tpu.pipeline_mode<synchronous>, transform_indices = @transform_6, window_bounds = array<i64: 8, 1>}, {transform_indices = @transform_7, window_bounds = array<i64: 8, 256>}]} {
    %c0 = arith.constant 0 : index
    %c0_0 = arith.constant 0 : index
    %0 = vector.load %arg2[%c0, %c0_0] : memref<64x32xbf16, #tpu.memory_space<vmem>>, vector<64x32xbf16>
    %c0_1 = arith.constant 0 : index
    %c0_2 = arith.constant 0 : index
    %1 = vector.load %arg1[%c0_1, %c0_2] : memref<32x256xbf16, #tpu.memory_space<vmem>>, vector<32x256xbf16>
    %cst = arith.constant dense<0.000000e+00> : vector<64x256xf32>
    %2 = tpu.matmul %0, %1, %cst {dimension_numbers = #tpu.dot_dimension_numbers<[1], [0], [0], [1], [0, 0, 1, 1], [], []>} : vector<64x32xbf16>, vector<32x256xbf16>, vector<64x256xf32> -> vector<64x256xf32>
    %c0_3 = arith.constant 0 : index
    %c0_4 = arith.constant 0 : index
    %3 = vector.load %arg3[%c0_3, %c0_4] : memref<64x1xf32, #tpu.memory_space<vmem>>, vector<64x1xf32>
    %4 = vector.broadcast %3 : vector<64x1xf32> to vector<64x256xf32>
    %5 = arith.addf %2, %4 : vector<64x256xf32>
    %cst_5 = arith.constant 0.000000e+00 : f32
    %6 = vector.broadcast %cst_5 : f32 to vector<64x256xf32>
    %7 = arith.maximumf %5, %6 : vector<64x256xf32>
    %8 = arith.truncf %7 : vector<64x256xf32> to vector<64x256xbf16>
    %c0_6 = arith.constant 0 : index
    %c0_7 = arith.constant 0 : index
    %9 = vector.load %arg4[%c0_6, %c0_7] : memref<64x64xbf16, #tpu.memory_space<vmem>>, vector<64x64xbf16>
    %cst_8 = arith.constant dense<0.000000e+00> : vector<64x256xf32>
    %10 = tpu.matmul %9, %8, %cst_8 {dimension_numbers = #tpu.dot_dimension_numbers<[1], [0], [0], [1], [0, 0, 1, 1], [], []>} : vector<64x64xbf16>, vector<64x256xbf16>, vector<64x256xf32> -> vector<64x256xf32>
    %c0_9 = arith.constant 0 : index
    %c0_10 = arith.constant 0 : index
    %11 = vector.load %arg5[%c0_9, %c0_10] : memref<64x1xf32, #tpu.memory_space<vmem>>, vector<64x1xf32>
    %12 = vector.broadcast %11 : vector<64x1xf32> to vector<64x256xf32>
    %13 = arith.addf %10, %12 : vector<64x256xf32>
    %cst_11 = arith.constant 0.000000e+00 : f32
    %14 = vector.broadcast %cst_11 : f32 to vector<64x256xf32>
    %15 = arith.maximumf %13, %14 : vector<64x256xf32>
    %16 = arith.truncf %15 : vector<64x256xf32> to vector<64x256xbf16>
    %c0_12 = arith.constant 0 : index
    %c0_13 = arith.constant 0 : index
    %17 = vector.load %arg6[%c0_12, %c0_13] : memref<8x64xbf16, #tpu.memory_space<vmem>>, vector<8x64xbf16>
    %cst_14 = arith.constant dense<0.000000e+00> : vector<8x256xf32>
    %18 = tpu.matmul %17, %16, %cst_14 {dimension_numbers = #tpu.dot_dimension_numbers<[1], [0], [0], [1], [0, 0, 1, 1], [], []>} : vector<8x64xbf16>, vector<64x256xbf16>, vector<8x256xf32> -> vector<8x256xf32>
    %c0_15 = arith.constant 0 : index
    %c0_16 = arith.constant 0 : index
    %19 = vector.load %arg7[%c0_15, %c0_16] : memref<8x1xf32, #tpu.memory_space<vmem>>, vector<8x1xf32>
    %20 = vector.broadcast %19 : vector<8x1xf32> to vector<8x256xf32>
    %21 = arith.addf %18, %20 : vector<8x256xf32>
    %cst_17 = arith.constant 0.000000e+00 : f32
    %22 = vector.broadcast %cst_17 : f32 to vector<8x256xf32>
    %23 = arith.maximumf %21, %22 : vector<8x256xf32>
    %c0_18 = arith.constant 0 : index
    %c0_19 = arith.constant 0 : index
    %24 = vector.load %arg8[%c0_18, %c0_19] : memref<8x256xf32, #tpu.memory_space<vmem>>, vector<8x256xf32>
    tpu.vector_store %arg8[%c0_18, %c0_19], %23 {strides = array<i32>} : memref<8x256xf32, #tpu.memory_space<vmem>>, vector<8x256xf32>,
    return
  }
  func.func @transform_0(%arg0: i32) -> (i32, i32) {
    %c0_i32 = arith.constant 0 : i32
    %c0_i32_0 = arith.constant 0 : i32
    return %c0_i32, %arg0 : i32, i32
  }
  func.func @transform_1(%arg0: i32) -> (i32, i32) {
    %c0_i32 = arith.constant 0 : i32
    %c0_i32_0 = arith.constant 0 : i32
    %c0_i32_1 = arith.constant 0 : i32
    return %c0_i32, %c0_i32_0 : i32, i32
  }
  func.func @transform_2(%arg0: i32) -> (i32, i32) {
    %c0_i32 = arith.constant 0 : i32
    %c0_i32_0 = arith.constant 0 : i32
    %c0_i32_1 = arith.constant 0 : i32
    return %c0_i32, %c0_i32_0 : i32, i32
  }
  func.func @transform_3(%arg0: i32) -> (i32, i32) {
    %c0_i32 = arith.constant 0 : i32
    %c0_i32_0 = arith.constant 0 : i32
    %c0_i32_1 = arith.constant 0 : i32
    return %c0_i32, %c0_i32_0 : i32, i32
  }
  func.func @transform_4(%arg0: i32) -> (i32, i32) {
    %c0_i32 = arith.constant 0 : i32
    %c0_i32_0 = arith.constant 0 : i32
    %c0_i32_1 = arith.constant 0 : i32
    return %c0_i32, %c0_i32_0 : i32, i32
  }
  func.func @transform_5(%arg0: i32) -> (i32, i32) {
    %c0_i32 = arith.constant 0 : i32
    %c0_i32_0 = arith.constant 0 : i32
    %c0_i32_1 = arith.constant 0 : i32
    return %c0_i32, %c0_i32_0 : i32, i32
  }
  func.func @transform_6(%arg0: i32) -> (i32, i32) {
    %c0_i32 = arith.constant 0 : i32
    %c0_i32_0 = arith.constant 0 : i32
    %c0_i32_1 = arith.constant 0 : i32
    return %c0_i32, %c0_i32_0 : i32, i32
  }
  func.func @transform_7(%arg0: i32) -> (i32, i32) {
    %c0_i32 = arith.constant 0 : i32
    %c0_i32_0 = arith.constant 0 : i32
    return %c0_i32, %arg0 : i32, i32
  }
}

</mosaic_0001>

<bundles_post_ra>
// kernel: _region_mask_mlp.1
= control target key start
LH: loop header
LB: loop body
LE: loop exit
PB: predicated region body
PF: predicated region fallthrough
CT: control target
= control target key end

     0   :  { %12 = vsyncpa [#allocation4], 0  ;;  %s1257_s0 = inlined_call_operand.vmem [shape: bf16[32,512], index: 0, kind: input, shape index: {}]   ;;  %s1258_s1 = inlined_call_operand.vmem [shape: bf16[64,32], index: 1, kind: input, shape index: {}]   ;;  %s1259_s2 = inlined_call_operand.vmem [shape: f32[64,1], index: 2, kind: input, shape index: {}]   ;;  %s1260_s3 = inlined_call_operand.vmem [shape: bf16[64,64], index: 3, kind: input, shape index: {}]   ;;  %s1261_s4 = inlined_call_operand.vmem [shape: f32[64,1], index: 4, kind: input, shape index: {}]   ;;  %s1262_s5 = inlined_call_operand.vmem [shape: bf16[8,64], index: 5, kind: input, shape index: {}]   ;;  %s1263_s6 = inlined_call_operand.vmem [shape: f32[8,1], index: 6, kind: input, shape index: {}]   ;;  %s1264_s7 = inlined_call_operand.hbm [shape: f32[8,512], index: 7, kind: output, shape index: {}]  }
   0x1   :  { %14 = vsyncpa [#allocation4 + $0x1], 0  ;;  %s1056_s24 = smov 0   ;;  %s1058_s25 = smov 0  }
   0x2   :  { %s1060_s26 = smov 0   ;;  %s1062_s27 = smov 0  }
   0x3 LB: > { %s858_s28 = sadd.s32 4294967295, %s1012_s27   ;;  %s859_s29 = sadd.s32 4294967294, %s1012_s27   ;;  %s1012_s27 = sphi %s1062_s27, %s1270_s27   ;;  %s1008_s26 = sphi %s1060_s26, %s1269_s26   ;;  %s1004_s25 = sphi %s1058_s25, %s1268_s25   ;;  %s1000_s24 = sphi %s1056_s24, %s1267_s24  }
   0x4   : > { %s1079_s30 = sadd.s32 1, %s1012_s27   ;;  %s27_s8 = sadd.s32 1, %s1008_s26 }
   0x5   : > { %s24_s9 = ssub.s32 %s1012_s27, %s1079_s30  ;;  %p34_p0 = scmp.ne.s32.totalorder %s1008_s26, %s1004_s25 }
   0x6   : > { %p25_p1 = scmp.eq.s32.totalorder %s24_s9, 0  ;;  %p35_p2 = scmp.eq.s32.totalorder %s1012_s27, 0 }
   0x7   : > { %p190_p3 = scmp.eq.s32.totalorder %s858_s28, 1  ;;  %p195_p4 = scmp.ne.s32.totalorder %s1004_s25, %s1000_s24 }
   0x8   : > { %s1092_s10 = scalar_select %p25_p1, %s1008_s26, %s27_s8  }
   0x9   : > { %p36_p5 = por %p35_p2, %p34_p0  ;;  %p1094_p6 = por %p190_p3, %p34_p0 }
   0xa   : > { %p196_p7 = scmp.eq.s32.totalorder %s859_s29, 1  ;;  %p861_p9 = scmp.ge.s32.totalorder %s1012_s27, 2 }
   0xc   : > { %p1098_p8 = por %p196_p7, %p195_p4  ;;  %230 = sbr.rel (%p861_p9) target bundleno = 23 (0x17), region = 40 }
  0x11   : > { %233 = sbr.rel (!%p36_p5) target bundleno = 23 (0x17), region = 44  ;;  %s235_s13 = sand.u32 (%p36_p5), 1, %s1008_s26  }
  0x12   : > { %s894_s14 = sshll.u32 (%p36_p5), %s1012_s27, 3  ;;  %s862_s15 = sshll.u32 (%p36_p5), %s235_s13, 5 }
  0x13   : > { %s240_s18 = scalar_lea.vmem (%p36_p5), %s1257_s0, %s894_s14  ;;  %s237_s19 = scalar_lea.vmem (%p36_p5), [#allocation2], %s862_s15 }
  0x14   : > { %v275_v0 = vld [vmem:[%s240_s18] sm:$0xff] (%p36_p5)  ;;  %v277_v1 = vld [vmem:[%s240_s18 + $0x10] sm:$0xff] (%p36_p5) }
  0x15   : > { %v279_v2 = vld [vmem:[%s240_s18 + $0x20] sm:$0xff] (%p36_p5)  ;;  %276 = vst [vmem:[%s237_s19] sm:$0xff] (%p36_p5), %v275_v0  ;;  %278 = vst [vmem:[%s237_s19 + $0x8] sm:$0xff] (%p36_p5), %v277_v1  ;;  %v281_v3 = vld [vmem:[%s240_s18 + $0x30] sm:$0xff] (%p36_p5) }
  0x16   : > { %280 = vst [vmem:[%s237_s19 + $0x10] sm:$0xff] %v279_v2  ;;  %282 = vst [vmem:[%s237_s19 + $0x18] sm:$0xff] %v281_v3 }
  0x17 PF: > { %p865_p10 = scmp.ge.s32.totalorder %s1012_s27, 1  ;;  %p287_p11 = scmp.lt.s32.totalorder %s1012_s27, 3 }
  0x19   : > { %p288_p12 = pnand %p865_p10, %p287_p11 }
  0x1a   : > { %s1113_s20 = sand.u32 (!%p288_p12), 1, %s1004_s25   ;;  %s895_s29 = sshll.u32 (!%p288_p12), %s858_s28, 8 }
  0x1b   : > { %291 = sbr.rel (%p288_p12) target bundleno = 745 (0x2e9), region = 82  ;;  %s866_s21 = sshll.u32 (!%p288_p12), %s1113_s20, 5 }
  0x1c   : > { %s296_s22 = scalar_lea.vmem (!%p288_p12), [#allocation2], %s866_s21  ;;  %s867_s23 = sshll.u32 (!%p288_p12), %s1113_s20, 4 }
  0x1d   : > { %s324_s8 = scalar_lea.vmem (!%p288_p12), [#allocation3], %s867_s23  ;;  %s1220_s15 = scalar_lea.hbm (!%p288_p12), %s1264_s7, %s895_s29 }
  0x1e   : > { %s794_s9 = sshll.u32 (!%p288_p12), %s324_s8, 4  ;;  %s780_s16 = scalar_lea.sflag (!%p288_p12), [#allocation4], %s1113_s20  ;;  %s795_s9 = int_to_ptr.vmem [resolvable:$true] %s794_s9 }
  0x1f   : > { %s952_s17 = scalar_lea.vmem (!%p288_p12), %s795_s9, 256  ;;  %s1015_s28 = smov (!%p288_p12), [#allocation3]  }
  0x20   : > { %v1014_v4 = vmov 0   ;;  %v938_v5 = vld [vmem:[%s296_s22 + $0x14] ss:$8 sps:$4 sm:$0xff]   ;;  %v940_v6 = vld [vmem:[%s296_s22 + $0x10] ss:$8 sps:$4 sm:$0xff]   ;;  %v344_v10 = vld [vmem:[%s1259_s2 + $0x20] sm:$0xff]  ;;  %p953_p13 = scmp.ne.s32.totalorder %s795_s9, %s952_s17 }
  0x21   : > { %473 = vmatprep.mubr.bf16.mxu0 %v1014_v4  ;;  %936 = vset.pattern.permute.xlu0 %v1014_v4  ;;  %v941_v7 = vld [vmem:[%s296_s22 + $0x4] ss:$8 sps:$4 sm:$0xff]   ;;  %v943_v8 = vld [vmem:[%s296_s22] ss:$8 sps:$4 sm:$0xff]   ;;  %v346_v9 = vld [vmem:[%s1259_s2 + $0x30] sm:$0xff]  ;;  %vm428_vm0 = vcmask 261120  }
  0x22   : > { %937 = vset.pattern.permute.xlu1 %v1014_v4  ;;  %659 = vmatprep.mubr.bf16.mxu1 %v1014_v4  ;;  %v944_v11 = vld [vmem:[%s1258_s1] sm:$0xff]   ;;  %v347_v12 = vld [vmem:[%s1259_s2 + $0x38] sm:$0xff]  ;;  %v345_v13 = vld [vmem:[%s1259_s2 + $0x28] sm:$0xff]  ;;  %vm614_vm1 = vcmask 523264   ;;  %p954_p0 = pnand %p953_p13, %p1094_p6  ;;  %s956_s18 = sshll.u32 %s1015_s28, 4  ;;  %s957_s18 = int_to_ptr.vmem [resolvable:$false] %s956_s18 }
  0x23   : > { %453 = vmatprep.subr.bf16.mxu0 %v938_v5  ;;  %380 = vperm.xlu0 %936, %v346_v9   ;;  %v342_v14 = vld [vmem:[%s1259_s2 + $0x10] sm:$0xff]  ;;  %v343_v15 = vld [vmem:[%s1259_s2 + $0x18] sm:$0xff]  ;;  %v945_v16 = vld [vmem:[%s1258_s1 + $0x8] sm:$0xff]   ;;  %s958_s19 = scalar_lea.vmem %s957_s18, 512  ;;  %p959_p2 = scmp.lt.s32.totalorder %s795_s9, %s957_s18 }
  0x24   : > { %454 = vmatpush1.bf16.msra.mxu0 %v940_v6  ;;  %370 = vperm.xlu1 %937, %v344_v10   ;;  %v340_v17 = vld [vmem:[%s1259_s2] sm:$0xff]  ;;  %v341_v18 = vld [vmem:[%s1259_s2 + $0x8] sm:$0xff]  ;;  %v552_v19 = vld [vmem:[%s1261_s4 + $0x30] sm:$0xff]  ;;  %p955_p1 = pneg %p954_p0  ;;  %p960_p3 = scmp.lt.s32.totalorder %s958_s19, %s952_s17 }
  0x25   : > { %455 = vmatprep.subr.bf16.mxu0 %v941_v7  ;;  %v553_v20 = vld [vmem:[%s1261_s4 + $0x38] sm:$0xff]  ;;  %v946_v21 = vld [vmem:[%s1258_s1 + $0x10] sm:$0xff]   ;;  %v550_v22 = vld [vmem:[%s1261_s4 + $0x20] sm:$0xff] }
  0x26   : > { %v551_v23 = vld [vmem:[%s1261_s4 + $0x28] sm:$0xff]  ;;  %v548_v24 = vld [vmem:[%s1261_s4 + $0x10] sm:$0xff]  ;;  %v549_v25 = vld [vmem:[%s1261_s4 + $0x18] sm:$0xff]  ;;  %p961_p4 = por %p960_p3, %p959_p2 }
  0x27   : > { %385 = vperm.xlu0 %936, %v347_v12   ;;  %v947_v26 = vld [vmem:[%s1258_s1 + $0x18] sm:$0xff]   ;;  %v546_v27 = vld [vmem:[%s1261_s4] sm:$0xff]  ;;  %v547_v28 = vld [vmem:[%s1261_s4 + $0x8] sm:$0xff] }
  0x28   : > { %456 = vmatpush1.bf16.msra.mxu0 %v943_v8  ;;  %375 = vperm.xlu1 %937, %v345_v13   ;;  %v725_v29 = vld [vmem:[%s1263_s6] sm:$0xff]  ;;  %p962_p5 = pnand %p961_p4, %p955_p1 }
  0x2b   : > { %876 = vmatmul.mubr.msk.bf16.vlgmr.msra.gmra.mxu0 %vm428_vm0, %v944_v11  ;;  %360 = vperm.xlu0 %936, %v342_v14  }
  0x2c   : > { %483 = vmatprep.mubr.bf16.mxu0 %v1014_v4  ;;  %365 = vperm.xlu1 %937, %v343_v15  }
  0x2f   : > { %350 = vperm.xlu0 %936, %v340_v17  }
  0x30   : > { %355 = vperm.xlu1 %937, %v341_v18  }
  0x33   : > { %877 = vmatmul.mubr.msk.bf16.gmra.mxu0 %vm428_vm0, %v945_v16  ;;  %586 = vperm.xlu0 %936, %v552_v19  }
  0x34   : > { %493 = vmatprep.mubr.bf16.mxu0 %v1014_v4  ;;  %591 = vperm.xlu1 %937, %v553_v20  }
  0x37   : > { %576 = vperm.xlu0 %936, %v550_v22  }
  0x38   : > { %581 = vperm.xlu1 %937, %v551_v23  }
  0x3b   : > { %878 = vmatmul.mubr.msk.bf16.gmra.mxu0 %vm428_vm0, %v946_v21  ;;  %566 = vperm.xlu0 %936, %v548_v24  }
  0x3c   : > { %503 = vmatprep.mubr.bf16.mxu0 %v1014_v4  ;;  %571 = vperm.xlu1 %937, %v549_v25  }
  0x3f   : > { %556 = vperm.xlu0 %936, %v546_v27  }
  0x40   : > { %561 = vperm.xlu1 %937, %v547_v28  }
  0x43   : > { %879 = vmatmul.mubr.msk.bf16.gmra.mxu0 %vm428_vm0, %v947_v26  ;;  %728 = vperm.xlu0 %936, %v725_v29  }
  0x44   : > { %766 = vmatprep.mubr.bf16.mxu0 %v1014_v4 }
  0x9e   : > { %v381_v41 = vpop.permute.xlu0 %380 }
  0x9f   : > { %v371_v39 = vpop.permute.xlu1 %370 }
  0xa2   : > { %v386_v46 = vpop.permute.xlu0 %385 }
  0xa3   : > { %v376_v44 = vpop.permute.xlu1 %375 }
  0xa6   : > { %v361_v57 = vpop.permute.xlu0 %360 }
  0xa7   : > { %v366_v52 = vpop.permute.xlu1 %365 }
  0xaa   : > { %v351_v13 = vpop.permute.xlu0 %350 }
  0xab   : > { %v356_v6 = vpop.permute.xlu1 %355 }
  0xeb   : > { %v475_v30 = vpop.f32.mrf.mxu0 }
  0xec   : > { %v476_v23 = vadd.f32 %v475_v30, %v351_v13  ;;  %v949_v30 = vld [vmem:[%s1260_s3 + $0x8] sm:$0xff]  }
  0xed   : > { %v477_v31 = vpop.f32.mrf.mxu0 }
  0xee   : > { %v478_v16 = vadd.f32 %v477_v31, %v351_v13  ;;  %v514_v29 = vmax.f32 %v476_v23, 0.0  ;;  %v948_v31 = vld [vmem:[%s1260_s3] sm:$0xff]  }
  0xef   : > { %v479_v32 = vpop.f32.mrf.mxu0 }
  0xf0   : > { %v480_v18 = vadd.f32 %v479_v32, %v356_v6  ;;  %v515_v25 = vmax.f32 %v478_v16, 0.0  ;;  %v950_v32 = vld [vmem:[%s1260_s3 + $0x10] sm:$0xff]  }
  0xf1   : > { %v481_v33 = vpop.f32.mrf.mxu0 }
  0xf2   : > { %v482_v10 = vadd.f32 %v481_v33, %v356_v6  ;;  %v516_v26 = vmax.f32 %v480_v18, 0.0 }
  0xf3   : > { %v485_v34 = vpop.f32.mrf.mxu0 }
  0xf4   : > { %v486_v14 = vadd.f32 %v485_v34, %v361_v57  ;;  %v517_v21 = vmax.f32 %v482_v10, 0.0  ;;  %v530_v33 = vpack.c.bf16 %v516_v26, %v514_v29  ;;  %v951_v34 = vld [vmem:[%s1260_s3 + $0x18] sm:$0xff]  }
  0xf5   : > { %v487_v35 = vpop.f32.mrf.mxu0 }
  0xf6   : > { %v488_v2 = vadd.f32 %v487_v35, %v361_v57  ;;  %v518_v24 = vmax.f32 %v486_v14, 0.0  ;;  %v531_v28 = vpack.c.bf16 %v517_v21, %v515_v25 }
  0xf7   : > { %v489_v36 = vpop.f32.mrf.mxu0 }
  0xf8   : > { %v490_v7 = vadd.f32 %v489_v36, %v366_v52  ;;  %v519_v17 = vmax.f32 %v488_v2, 0.0 }
  0xf9   : > { %v491_v37 = vpop.f32.mrf.mxu0 }
  0xfa   : > { %v492_v60 = vadd.f32 %v491_v37, %v366_v52  ;;  %v520_v19 = vmax.f32 %v490_v7, 0.0 }
  0xfb   : > { %v495_v38 = vpop.f32.mrf.mxu0 }
  0xfc   : > { %v496_v0 = vadd.f32 %v495_v38, %v371_v39  ;;  %v521_v11 = vmax.f32 %v492_v60, 0.0  ;;  %v532_v27 = vpack.c.bf16 %v520_v19, %v518_v24 }
  0xfd   : > { %v497_v40 = vpop.f32.mrf.mxu0 }
  0xfe   : > { %v498_v55 = vadd.f32 %v497_v40, %v371_v39  ;;  %v522_v15 = vmax.f32 %v496_v0, 0.0  ;;  %v533_v22 = vpack.c.bf16 %v521_v11, %v519_v17 }
  0xff   : > { %v499_v42 = vpop.f32.mrf.mxu0 }
 0x100   : > { %v500_v58 = vadd.f32 %v499_v42, %v376_v44  ;;  %v523_v3 = vmax.f32 %v498_v55, 0.0 }
 0x101   : > { %v501_v43 = vpop.f32.mrf.mxu0 }
 0x102   : > { %v502_v49 = vadd.f32 %v501_v43, %v376_v44  ;;  %v524_v8 = vmax.f32 %v500_v58, 0.0  ;;  %v592_v44 = vpop.permute.xlu1 %591 }
 0x103   : > { %v505_v45 = vpop.f32.mrf.mxu0 }
 0x104   : > { %v506_v53 = vadd.f32 %v505_v45, %v381_v41  ;;  %v525_v61 = vmax.f32 %v502_v49, 0.0  ;;  %v534_v20 = vpack.c.bf16 %v524_v8, %v522_v15 }
 0x105   : > { %v507_v47 = vpop.f32.mrf.mxu0 }
 0x106   : > { %v508_v50 = vadd.f32 %v507_v47, %v381_v41  ;;  %v526_v1 = vmax.f32 %v506_v53, 0.0  ;;  %v535_v12 = vpack.c.bf16 %v525_v61, %v523_v3 }
 0x107   : > { %v509_v48 = vpop.f32.mrf.mxu0 }
 0x108   : > { %v510_v51 = vadd.f32 %v509_v48, %v386_v46  ;;  %v527_v62 = vmax.f32 %v508_v50, 0.0  ;;  %v582_v48 = vpop.permute.xlu1 %581 }
 0x109   : > { %v511_v54 = vpop.f32.mrf.mxu0 }
 0x10a   : > { %v512_v56 = vadd.f32 %v511_v54, %v386_v46  ;;  %v528_v59 = vmax.f32 %v510_v51, 0.0  ;;  %v587_v46 = vpop.permute.xlu0 %586 }
 0x10c   : > { %v529_v63 = vmax.f32 %v512_v56, 0.0  ;;  %v536_v9 = vpack.c.bf16 %v528_v59, %v526_v1  ;;  %v572_v56 = vpop.permute.xlu1 %571 }
 0x10e   : > { %v537_v5 = vpack.c.bf16 %v529_v63, %v527_v62  ;;  %v577_v50 = vpop.permute.xlu0 %576 }
 0x110   : > { %635 = vmatprep.subr.bf16.mxu1 %v537_v5  ;;  %v562_v10 = vpop.permute.xlu1 %561 }
 0x111   : > { %636 = vmatpush1.bf16.msra.mxu1 %v536_v9 }
 0x112   : > { %637 = vmatprep.subr.bf16.mxu1 %v535_v12  ;;  %v567_v61 = vpop.permute.xlu0 %566 }
 0x115   : > { %638 = vmatpush1.bf16.msra.mxu1 %v534_v20 }
 0x116   : > { %639 = vmatprep.subr.bf16.mxu1 %v533_v22  ;;  %v557_v17 = vpop.permute.xlu0 %556 }
 0x119   : > { %640 = vmatpush1.bf16.msra.mxu1 %v532_v27 }
 0x11a   : > { %641 = vmatprep.subr.bf16.mxu1 %v531_v28 }
 0x11d   : > { %642 = vmatpush1.bf16.msra.mxu1 %v530_v33 }
 0x120   : > { %884 = vmatmul.mubr.msk.bf16.vlgmr.msra.gmra.mxu1 %vm614_vm1, %v948_v31 }
 0x121   : > { %669 = vmatprep.mubr.bf16.mxu1 %v1014_v4 }
 0x128   : > { %885 = vmatmul.mubr.msk.bf16.gmra.mxu1 %vm614_vm1, %v949_v30 }
 0x129   : > { %679 = vmatprep.mubr.bf16.mxu1 %v1014_v4 }
 0x130   : > { %886 = vmatmul.mubr.msk.bf16.gmra.mxu1 %vm614_vm1, %v950_v32 }
 0x131   : > { %689 = vmatprep.mubr.bf16.mxu1 %v1014_v4 }
 0x138   : > { %887 = vmatmul.mubr.msk.bf16.gmra.mxu1 %vm614_vm1, %v951_v34 }
 0x1e0   : > { %v661_v35 = vpop.f32.mrf.mxu1 }
 0x1e1   : > { %v662_v27 = vadd.f32 %v661_v35, %v557_v17  ;;  %v729_v35 = vpop.permute.xlu0 %728 }
 0x1e2   : > { %v663_v36 = vpop.f32.mrf.mxu1 }
 0x1e3   : > { %v664_v20 = vadd.f32 %v663_v36, %v557_v17  ;;  %v700_v32 = vmax.f32 %v662_v27, 0.0  ;;  %v724_v36 = vld [vmem:[%s1262_s5] sm:$0xf] }
 0x1e4   : > { %v665_v37 = vpop.f32.mrf.mxu1 }
 0x1e5   : > { %v666_v22 = vadd.f32 %v665_v37, %v562_v10  ;;  %v701_v29 = vmax.f32 %v664_v20, 0.0 }
 0x1e6   : > { %v667_v38 = vpop.f32.mrf.mxu1 }
 0x1e7   : > { %v668_v14 = vadd.f32 %v667_v38, %v562_v10  ;;  %v702_v33 = vmax.f32 %v666_v22, 0.0 }
 0x1e8   : > { %v671_v39 = vpop.f32.mrf.mxu1 }
 0x1e9   : > { %v672_v18 = vadd.f32 %v671_v39, %v567_v61  ;;  %v703_v25 = vmax.f32 %v668_v14, 0.0  ;;  %v716_v34 = vpack.c.bf16 %v702_v33, %v700_v32 }
 0x1ea   : > { %v673_v40 = vpop.f32.mrf.mxu1 }
 0x1eb   : > { %v674_v7 = vadd.f32 %v673_v40, %v567_v61  ;;  %v704_v28 = vmax.f32 %v672_v18, 0.0  ;;  %v717_v30 = vpack.c.bf16 %v703_v25, %v701_v29 }
 0x1ec   : > { %v675_v41 = vpop.f32.mrf.mxu1 }
 0x1ed   : > { %v676_v11 = vadd.f32 %v675_v41, %v572_v56  ;;  %v705_v21 = vmax.f32 %v674_v7, 0.0 }
 0x1ee   : > { %v677_v42 = vpop.f32.mrf.mxu1 }
 0x1ef   : > { %v678_v0 = vadd.f32 %v677_v42, %v572_v56  ;;  %v706_v23 = vmax.f32 %v676_v11, 0.0 }
 0x1f0   : > { %v681_v43 = vpop.f32.mrf.mxu1 }
 0x1f1   : > { %v682_v5 = vadd.f32 %v681_v43, %v577_v50  ;;  %v707_v15 = vmax.f32 %v678_v0, 0.0  ;;  %v718_v31 = vpack.c.bf16 %v706_v23, %v704_v28 }
 0x1f2   : > { %v683_v45 = vpop.f32.mrf.mxu1 }
 0x1f3   : > { %v684_v59 = vadd.f32 %v683_v45, %v577_v50  ;;  %v708_v19 = vmax.f32 %v682_v5, 0.0  ;;  %v719_v26 = vpack.c.bf16 %v707_v15, %v705_v21 }
 0x1f4   : > { %v685_v47 = vpop.f32.mrf.mxu1 }
 0x1f5   : > { %v686_v62 = vadd.f32 %v685_v47, %v582_v48  ;;  %v709_v8 = vmax.f32 %v684_v59, 0.0 }
 0x1f6   : > { %v687_v4 = vpop.f32.mrf.mxu1 }
 0x1f7   : > { %v688_v53 = vadd.f32 %v687_v4, %v582_v48  ;;  %v710_v12 = vmax.f32 %v686_v62, 0.0 }
 0x1f8   : > { %v691_v49 = vpop.f32.mrf.mxu1 }
 0x1f9   : > { %v692_v57 = vadd.f32 %v691_v49, %v587_v46  ;;  %v711_v1 = vmax.f32 %v688_v53, 0.0  ;;  %v720_v24 = vpack.c.bf16 %v710_v12, %v708_v19 }
 0x1fa   : > { %v693_v51 = vpop.f32.mrf.mxu1 }
 0x1fb   : > { %v694_v54 = vadd.f32 %v693_v51, %v587_v46  ;;  %v712_v6 = vmax.f32 %v692_v57, 0.0  ;;  %v721_v16 = vpack.c.bf16 %v711_v1, %v709_v8 }
 0x1fc   : > { %v695_v52 = vpop.f32.mrf.mxu1 }
 0x1fd   : > { %v696_v55 = vadd.f32 %v695_v52, %v592_v44  ;;  %v713_v2 = vmax.f32 %v694_v54, 0.0 }
 0x1fe   : > { %v697_v58 = vpop.f32.mrf.mxu1 }
 0x1ff   : > { %v698_v60 = vadd.f32 %v697_v58, %v592_v44  ;;  %v714_v63 = vmax.f32 %v696_v55, 0.0 }
 0x201   : > { %v715_v3 = vmax.f32 %v698_v60, 0.0  ;;  %v722_v13 = vpack.c.bf16 %v714_v63, %v712_v6 }
 0x203   : > { %v723_v9 = vpack.c.bf16 %v715_v3, %v713_v2 }
 0x205   : > { %742 = vmatprep.subr.bf16.mxu0 %v723_v9 }
 0x206   : > { %743 = vmatpush1.bf16.msra.mxu0 %v722_v13 }
 0x207   : > { %744 = vmatprep.subr.bf16.mxu0 %v721_v16 }
 0x20a   : > { %745 = vmatpush1.bf16.msra.mxu0 %v720_v24 }
 0x20b   : > { %746 = vmatprep.subr.bf16.mxu0 %v719_v26 }
 0x20e   : > { %747 = vmatpush1.bf16.msra.mxu0 %v718_v31 }
 0x20f   : > { %748 = vmatprep.subr.bf16.mxu0 %v717_v30 }
 0x212   : > { %749 = vmatpush1.bf16.msra.mxu0 %v716_v34 }
 0x215   : > { %888 = vmatmul.mubr.msk.bf16.vlgmr.msra.gmra.mxu0 %vm614_vm1, %v724_v36 }
 0x2d5   : > { %v768_v37 = vpop.f32.mrf.mxu0 }
 0x2d6   : > { %v769_v38 = vadd.f32 %v768_v37, %v729_v35 }
 0x2d7   : > { %v770_v39 = vpop.f32.mrf.mxu0 }
 0x2d8   : > { %v775_v40 = vmax.f32 %v769_v38, 0.0  ;;  %v771_v41 = vadd.f32 %v770_v39, %v729_v35 }
 0x2d9   : > { %v772_v42 = vpop.f32.mrf.mxu0 }
 0x2da   : > { %777 = vst [vmem:[%s324_s8] sm:$0xff] %v775_v40  ;;  %v776_v43 = vmax.f32 %v771_v41, 0.0 }
 0x2db   : > { %v773_v44 = vpop.f32.mrf.mxu0 }
 0x2dc   : > { %778 = vst [vmem:[%s324_s8 + $0x8] sm:$0xff] %v776_v43 }
 0x2dd   : > { %965 = shalt.err (!%p962_p5)
}
 0x2de   : > { %s966_s21 = scalar_lea.hbm %s1220_s15, 256  ;;  %s970_s23 = scalar_lea.hbm %s1264_s7, 512 }
 0x2df   : > { %p967_p7 = scmp.ne.s32.totalorder %s1220_s15, %s966_s21  ;;  %p971_p12 = scmp.lt.s32.totalorder %s1220_s15, %s1264_s7 }
 0x2e0   : > { %p972_p13 = scmp.lt.s32.totalorder %s970_s23, %s966_s21 }
 0x2e1   : > { %p968_p10 = pnand %p967_p7, %p1094_p6 }
 0x2e2   : > { %p973_p0 = por %p972_p13, %p971_p12 }
 0x2e3   : > { %p969_p11 = pneg %p968_p10 }
 0x2e5   : > { %p974_p1 = pnand %p973_p0, %p969_p11 }
 0x2e7   : > { %977 = shalt.err (!%p974_p1)
}
 0x2e8   : > { %896 = dma.vmem_to_hbm [thread:$0]  (%p1094_p6), %s795_s9, 256, %s1220_s15, %s780_s16  }
 0x2e9 PF: > { %s806_s13 = sand.u32 1, %s1000_s24   ;;  %p899_p2 = pnand %p861_p9, %p1098_p8 }
 0x2ea   : > { %s807_s14 = scalar_lea.sflag [#allocation4], %s806_s13 }
 0x2eb   : > { %p900_p3 = pneg %p899_p2 }
 0x2ed   : > { %995 = dma.done.wait (%p900_p3), %s807_s14, 256  }
 0x2ee   : > { %997 = vsyncadd (%p900_p3), %s807_s14, 4294967040  ;;  %p17_p4 = scmp.ge.s32.totalorder %s1079_s30, 4   ;;  %s1267_s24 = smov %s1004_s25 }
 0x2ef   : > { %s1268_s25 = smov %s1008_s26  ;;  %s1269_s26 = smov %s1092_s10 }
 0x2f0   : > { %s1270_s27 = smov %s1079_s30  ;;  %19 = sbr.rel (!%p17_p4) target bundleno = 3 (0x3), region = 126 }
 0x2f5   :  { %812 = vsyncpa [#allocation4], 1 }
 0x2f6   :  { %814 = vsyncpa [#allocation4 + $0x1], 1 }

</bundles_post_ra>
